<compile_context>
chip_gen: v6e
topology: v6e:2x2x1
jax: 0.10.0
libtpu: 0.0.40
codegen_flags: <defaults>
</compile_context>

<pallas_src>
import jax
import jax.numpy as jnp
from jax.experimental import pallas as pl
from jax.experimental.pallas import tpu as pltpu


def _mlp_kernel(x_ref, w1_ref, b1_ref, w2_ref, b2_ref, o_ref):
    # x_ref:  (TB, D) vec dtype      w1_ref: (D, H) bf16    b1_ref: (1, H) f32
    # w2_ref: (H, D)  bf16           b2_ref: (1, D) f32     o_ref:  (TB, D) vec dtype
    xb = x_ref[...].astype(w1_ref.dtype)

    # Linear1 + ReLU:  h = x @ W1 + b1   (MXU, bf16 operands, f32 accumulate)
    h = jnp.dot(xb, w1_ref[...], preferred_element_type=jnp.float32)
    h = jnp.maximum(h + b1_ref[...], 0.0)

    # Linear2:  y = h @ W2 + b2
    y = jnp.dot(h.astype(w2_ref.dtype), w2_ref[...],
                preferred_element_type=jnp.float32) + b2_ref[...]

    # dropout == identity (eval mode); residual add in f32.  x is re-read from
    # its VMEM block buffer so no full-tile value stays live across both matmuls.
    o_ref[...] = (y + x_ref[...].astype(jnp.float32)).astype(o_ref.dtype)


def simple_mlp_forward(vec, w1, b1, w2, b2, *, block_b=8192,
                       compute_dtype=jnp.bfloat16):
    """vec: (B, num_vec_in, 3). w1: (D, H), b1: (H,), w2: (H, D), b2: (D,).

    Returns (B, num_vec_in, 3) in vec.dtype.
    """
    B, V, three = vec.shape
    assert three == 3
    D = V * 3
    H = w1.shape[1]
    assert w1.shape == (D, H) and w2.shape == (H, D)
    assert b1.shape == (H,) and b2.shape == (D,)

    SUB = 8
    block_b = max(SUB, (block_b // SUB) * SUB)
    # Batch tile: multiple of 8 sublanes, capped at block_b; Pallas handles a
    # ragged last block (OOB reads are row-local garbage, OOB writes masked).
    TB = min(block_b, pl.cdiv(B, SUB) * SUB)
    grid = (pl.cdiv(B, TB),)

    # Natural layout in/out; all reshapes below are metadata-only.
    x = vec.reshape(B, D)
    w1c = w1.astype(compute_dtype)                      # (D, H), VMEM-resident
    w2c = w2.astype(compute_dtype)                      # (H, D), VMEM-resident
    b1c = b1.reshape(1, H).astype(jnp.float32)
    b2c = b2.reshape(1, D).astype(jnp.float32)

    # Advisory cost hint for XLA scheduling around the custom call.
    flops = 4 * B * D * H
    bytes_accessed = (x.size * x.dtype.itemsize                  # activation read
                      + x.size * vec.dtype.itemsize              # output write
                      + (w1c.size + w2c.size) * w1c.dtype.itemsize
                      + (b1c.size + b2c.size) * 4)

    # VMEM budget: in/out blocks are lane-padded (D=24 -> 128 lanes), double
    # buffered (4 x TB*128*4 B) plus ~3 compiler temporaries of the same row
    # footprint.  Cap well under v7x's 64 MiB physical VMEM.
    est_vmem = TB * 128 * 4 * 7
    vmem_limit = max(min(int(est_vmem * 1.5) + (4 << 20), 112 << 20), 32 << 20)

    out = pl.pallas_call(
        _mlp_kernel,
        out_shape=jax.ShapeDtypeStruct((B, D), vec.dtype),
        grid=grid,
        in_specs=[
            pl.BlockSpec((TB, D), lambda i: (i, 0)),     # x (tiled on batch)
            pl.BlockSpec((D, H), lambda i: (0, 0)),      # W1 (VMEM-resident)
            pl.BlockSpec((1, H), lambda i: (0, 0)),      # b1
            pl.BlockSpec((H, D), lambda i: (0, 0)),      # W2 (VMEM-resident)
            pl.BlockSpec((1, D), lambda i: (0, 0)),      # b2
        ],
        out_specs=pl.BlockSpec((TB, D), lambda i: (i, 0)),
        compiler_params=pltpu.CompilerParams(
            # Batch tiles are independent -> shard grid across TensorCores.
            dimension_semantics=("parallel",),
            vmem_limit_bytes=vmem_limit),
        cost_estimate=pl.CostEstimate(flops=flops, transcendentals=0,
                                      bytes_accessed=bytes_accessed),
    )(x, w1c, b1c, w2c, b2c)

    return out.reshape(B, V, 3)


def reference_forward(vec, w1, b1, w2, b2, compute_dtype=jnp.bfloat16):
    """Pure-JAX reference mirroring the kernel's numerics (bf16 MXU, f32 accum)."""
    B = vec.shape[0]
    x = vec.reshape(B, -1).astype(jnp.float32)
    h = jnp.dot(x.astype(compute_dtype), w1.astype(compute_dtype),
                preferred_element_type=jnp.float32) + b1
    h = jnp.maximum(h, 0.0)
    y = jnp.dot(h.astype(compute_dtype), w2.astype(compute_dtype),
                preferred_element_type=jnp.float32) + b2
    return (y + x).reshape(vec.shape).astype(vec.dtype)


def make_params(key, num_vec_in, n=2, dtype=jnp.float32):
    """Deterministic parameter construction (shapes from SimpleMLP.__init__).

    Note: the PyTorch module glorot-inits Linear1 and zero-inits Linear2's weight;
    here both are glorot-scaled uniform so the kernel's second matmul is actually
    exercised. Biases start at zero, matching the module.
    """
    D = num_vec_in * 3
    H = D * n
    k1, k2 = jax.random.split(key, 2)
    lim1 = (6.0 / (D + H)) ** 0.5
    lim2 = (6.0 / (H + D)) ** 0.5
    w1 = jax.random.uniform(k1, (D, H), dtype, minval=-lim1, maxval=lim1)
    w2 = jax.random.uniform(k2, (H, D), dtype, minval=-lim2, maxval=lim2)
    b1 = jnp.zeros((H,), dtype)
    b2 = jnp.zeros((D,), dtype)
    return w1, b1, w2, b2


if __name__ == "__main__":
    B, num_vec_in, n = 8, 8, 2          # vec: (8, 8, 3) -> D=24, H=48
    key = jax.random.PRNGKey(0)
    k_vec, k_par = jax.random.split(key)

    vec = jax.random.normal(k_vec, (B, num_vec_in, 3), dtype=jnp.float32)
    w1, b1, w2, b2 = make_params(k_par, num_vec_in, n)

    fwd = jax.jit(simple_mlp_forward)
    out = jax.block_until_ready(fwd(vec, w1, b1, w2, b2))

    ref = reference_forward(vec, w1, b1, w2, b2)
    assert out.shape == (B, num_vec_in, 3)
    assert jnp.allclose(out, ref, atol=1e-4, rtol=1e-3), "mismatch vs reference"

    print("KERNEL_OK")
</pallas_src>

<mosaic_0001>
module attributes {stable_mosaic.version = 11 : i64} {
  func.func @_mlp_kernel(%arg0: i32, %arg1: memref<8x24xf32, #tpu.memory_space<vmem>>, %arg2: memref<24x48xbf16, #tpu.memory_space<vmem>>, %arg3: memref<1x48xf32, #tpu.memory_space<vmem>>, %arg4: memref<48x24xbf16, #tpu.memory_space<vmem>>, %arg5: memref<1x24xf32, #tpu.memory_space<vmem>>, %arg6: memref<8x24xf32, #tpu.memory_space<vmem>>) attributes {dimension_semantics = [#tpu.dimension_semantics<parallel>], iteration_bounds = array<i64: 1>, scalar_prefetch = 0 : i64, scratch_operands = 0 : i64, tpu.core_type = #tpu.core_type<tc>, window_params = [{transform_indices = @transform_0, window_bounds = array<i64: 8, 24>}, {pipeline_mode = #tpu.pipeline_mode<synchronous>, transform_indices = @transform_1, window_bounds = array<i64: 24, 48>}, {pipeline_mode = #tpu.pipeline_mode<synchronous>, transform_indices = @transform_2, window_bounds = array<i64: 1, 48>}, {pipeline_mode = #tpu.pipeline_mode<synchronous>, transform_indices = @transform_3, window_bounds = array<i64: 48, 24>}, {pipeline_mode = #tpu.pipeline_mode<synchronous>, transform_indices = @transform_4, window_bounds = array<i64: 1, 24>}, {transform_indices = @transform_5, window_bounds = array<i64: 8, 24>}]} {
    %c0 = arith.constant 0 : index
    %c0_0 = arith.constant 0 : index
    %0 = vector.load %arg1[%c0, %c0_0] : memref<8x24xf32, #tpu.memory_space<vmem>>, vector<8x24xf32>
    %1 = arith.truncf %0 : vector<8x24xf32> to vector<8x24xbf16>
    %c0_1 = arith.constant 0 : index
    %c0_2 = arith.constant 0 : index
    %2 = vector.load %arg2[%c0_1, %c0_2] : memref<24x48xbf16, #tpu.memory_space<vmem>>, vector<24x48xbf16>
    %cst = arith.constant dense<0.000000e+00> : vector<8x48xf32>
    %3 = tpu.matmul %1, %2, %cst {dimension_numbers = #tpu.dot_dimension_numbers<[1], [0], [0], [1], [0, 0, 1, 1], [], []>} : vector<8x24xbf16>, vector<24x48xbf16>, vector<8x48xf32> -> vector<8x48xf32>
    %c0_3 = arith.constant 0 : index
    %c0_4 = arith.constant 0 : index
    %4 = vector.load %arg3[%c0_3, %c0_4] : memref<1x48xf32, #tpu.memory_space<vmem>>, vector<1x48xf32>
    %5 = vector.broadcast %4 : vector<1x48xf32> to vector<8x48xf32>
    %6 = arith.addf %3, %5 : vector<8x48xf32>
    %cst_5 = arith.constant 0.000000e+00 : f32
    %7 = vector.broadcast %cst_5 : f32 to vector<8x48xf32>
    %8 = arith.maximumf %6, %7 : vector<8x48xf32>
    %9 = arith.truncf %8 : vector<8x48xf32> to vector<8x48xbf16>
    %c0_6 = arith.constant 0 : index
    %c0_7 = arith.constant 0 : index
    %10 = vector.load %arg4[%c0_6, %c0_7] : memref<48x24xbf16, #tpu.memory_space<vmem>>, vector<48x24xbf16>
    %cst_8 = arith.constant dense<0.000000e+00> : vector<8x24xf32>
    %11 = tpu.matmul %9, %10, %cst_8 {dimension_numbers = #tpu.dot_dimension_numbers<[1], [0], [0], [1], [0, 0, 1, 1], [], []>} : vector<8x48xbf16>, vector<48x24xbf16>, vector<8x24xf32> -> vector<8x24xf32>
    %c0_9 = arith.constant 0 : index
    %c0_10 = arith.constant 0 : index
    %12 = vector.load %arg5[%c0_9, %c0_10] : memref<1x24xf32, #tpu.memory_space<vmem>>, vector<1x24xf32>
    %13 = vector.broadcast %12 : vector<1x24xf32> to vector<8x24xf32>
    %14 = arith.addf %11, %13 : vector<8x24xf32>
    %c0_11 = arith.constant 0 : index
    %c0_12 = arith.constant 0 : index
    %15 = vector.load %arg1[%c0_11, %c0_12] : memref<8x24xf32, #tpu.memory_space<vmem>>, vector<8x24xf32>
    %16 = arith.addf %14, %15 : vector<8x24xf32>
    %c0_13 = arith.constant 0 : index
    %c0_14 = arith.constant 0 : index
    %17 = vector.load %arg6[%c0_13, %c0_14] : memref<8x24xf32, #tpu.memory_space<vmem>>, vector<8x24xf32>
    tpu.vector_store %arg6[%c0_13, %c0_14], %16 {strides = array<i32>} : memref<8x24xf32, #tpu.memory_space<vmem>>, vector<8x24xf32>,
    return
  }
  func.func @transform_0(%arg0: i32) -> (i32, i32) {
    %c0_i32 = arith.constant 0 : i32
    %c0_i32_0 = arith.constant 0 : i32
    return %arg0, %c0_i32 : i32, i32
  }
  func.func @transform_1(%arg0: i32) -> (i32, i32) {
    %c0_i32 = arith.constant 0 : i32
    %c0_i32_0 = arith.constant 0 : i32
    %c0_i32_1 = arith.constant 0 : i32
    return %c0_i32, %c0_i32_0 : i32, i32
  }
  func.func @transform_2(%arg0: i32) -> (i32, i32) {
    %c0_i32 = arith.constant 0 : i32
    %c0_i32_0 = arith.constant 0 : i32
    %c0_i32_1 = arith.constant 0 : i32
    return %c0_i32, %c0_i32_0 : i32, i32
  }
  func.func @transform_3(%arg0: i32) -> (i32, i32) {
    %c0_i32 = arith.constant 0 : i32
    %c0_i32_0 = arith.constant 0 : i32
    %c0_i32_1 = arith.constant 0 : i32
    return %c0_i32, %c0_i32_0 : i32, i32
  }
  func.func @transform_4(%arg0: i32) -> (i32, i32) {
    %c0_i32 = arith.constant 0 : i32
    %c0_i32_0 = arith.constant 0 : i32
    %c0_i32_1 = arith.constant 0 : i32
    return %c0_i32, %c0_i32_0 : i32, i32
  }
  func.func @transform_5(%arg0: i32) -> (i32, i32) {
    %c0_i32 = arith.constant 0 : i32
    %c0_i32_0 = arith.constant 0 : i32
    return %arg0, %c0_i32 : i32, i32
  }
}

</mosaic_0001>

<bundles_post_ra>
// kernel: simple_mlp_forward.1
= control target key start
LH: loop header
LB: loop body
LE: loop exit
PB: predicated region body
PF: predicated region fallthrough
CT: control target
= control target key end

     0   :  { %vm46_vm0 = vcmask 1043456   ;;  %v214_v0 = vmov 0.0   ;;  %vm215_vm1 = vmmov 0   ;;  %vm42_vm2 = vcmask 195584   ;;  %s275_s1 = inlined_call_operand.vmem [shape: bf16[24,48], index: 1, kind: input, shape index: {}]   ;;  %s276_s3 = inlined_call_operand.vmem [shape: bf16[48,24], index: 3, kind: input, shape index: {}]   ;;  %s277_s0 = inlined_call_operand.vmem [shape: f32[8,24], index: 0, kind: input, shape index: {}]   ;;  %s278_s2 = inlined_call_operand.vmem [shape: f32[1,48], index: 2, kind: input, shape index: {}]   ;;  %s279_s4 = inlined_call_operand.vmem [shape: f32[1,24], index: 4, kind: input, shape index: {}]   ;;  %s280_s5 = inlined_call_operand.vmem [shape: f32[8,24], index: 5, kind: output, shape index: {}]  }
   0x1   :  { %189 = vmatprep.subr.bf16.mxu0 %v214_v0  ;;  %v209_v1 = vld [vmem:[%s275_s1 + $0x8] ss:$0 sps:$4 sm:$0xff]   ;;  %193 = vmatprep.mubr.msk.bf16.mxu0 %vm215_vm1, %v214_v0  ;;  %v210_v2 = vld [vmem:[%s275_s1] sm:$0xff]   ;;  %v211_v4 = vld [vmem:[%s276_s3 + $0x10] sm:$0xff]   ;;  %vm123_vm3 = vcmask 392192  }
   0x2   :  { %197 = vmatprep.subr.bf16.mxu1 %v214_v0  ;;  %203 = vmatprep.mubr.msk.bf16.mxu1 %vm215_vm1, %v214_v0  ;;  %v48_v3 = vsel %vm46_vm0, %v209_v1, 0  ;;  %v21_v5 = vld [vmem:[%s277_s0] sm:$0xff]  ;;  %v212_v7 = vld [vmem:[%s276_s3 + $0x8] sm:$0xff]  }
   0x3   :  { %190 = vmatpush3.bf16.msra.mxu0 %v48_v3  ;;  %198 = vmatpush3.bf16.msra.mxu1 %v211_v4  ;;  %v22_v6 = vpack.c.bf16 %v21_v5, %v21_v5  ;;  %v213_v8 = vld [vmem:[%s276_s3] sm:$0xff]  }
   0x4   :  { %191 = vmatprep.subr.bf16.mxu0 %v214_v0  ;;  %199 = vmatprep.subr.bf16.mxu1 %v214_v0  ;;  %v173_v9 = vld [vmem:[%s278_s2] ss:$0 sm:$0xff] }
   0x5   :  { %v177_v17 = vld [vmem:[%s279_s4] ss:$0 sm:$0xff] }
   0x7   :  { %192 = vmatpush3.bf16.msra.mxu0 %v210_v2  ;;  %200 = vmatpush3.bf16.msra.mxu1 %v212_v7 }
   0x8   :  { %201 = vmatprep.subr.bf16.mxu1 %v214_v0 }
   0xa   :  { %194 = vmatmul.mubr.msk.bf16.vlgmr.msra.gmra.mxu0 %vm42_vm2, %v22_v6 }
   0xb   :  { %202 = vmatpush3.bf16.msra.mxu1 %v213_v8 }
  0xca   :  { %v84_v10 = vpop.f32.mrf.mxu0 }
  0xcb   :  { %v85_v11 = vadd.f32 %v173_v9, %v84_v10 }
  0xcc   :  { %v195_v12 = vpop.f32.mrf.mxu0 }
  0xcd   :  { %v90_v13 = vmax.f32 %v85_v11, 0.0 }
  0xce   :  { %v87_v14 = vpop.f32.mrf.mxu0 }
  0xcf   :  { %v91_v15 = vpack.c.bf16 %v90_v13, %v90_v13 }
  0xd0   :  { %v196_v16 = vpop.f32.mrf.mxu0 }
  0xd1   :  { %204 = vmatmul.mubr.msk.bf16.vlgmr.msra.gmra.mxu1 %vm123_vm3, %v91_v15 }
 0x191   :  { %v161_v18 = vpop.f32.mrf.mxu1 }
 0x192   :  { %v162_v19 = vadd.f32 %v177_v17, %v161_v18 }
 0x193   :  { %v205_v20 = vpop.f32.mrf.mxu1 }
 0x194   :  { %v167_v21 = vadd.f32 %v162_v19, %v21_v5 }
 0x195   :  { %v164_v22 = vpop.f32.mrf.mxu1 }
 0x196   :  { %168 = vst.msk [vmem:[%s280_s5] sm:$0xff] %vm42_vm2, %v167_v21 }
 0x197   :  { %v206_v23 = vpop.f32.mrf.mxu1 }

</bundles_post_ra>
